<compile_context>
chip_gen: v5e
topology: v5e:2x2
jax: 0.10.0
libtpu: 0.0.40
codegen_flags: <defaults>
</compile_context>

<pallas_src>
import functools

import jax
import jax.numpy as jnp
import numpy as np
from jax.experimental import pallas as pl
from jax.experimental.pallas import tpu as pltpu


def _focal_loss_kernel(x_ref, t_ref, out_ref, acc_sum_ref, acc_cnt_ref, *,
                       gamma, ignore_index, n_rows, block_rows, steps_per_split):
    """One grid step over a (block_rows, C) tile of logits.

    Grid is (num_splits, steps_per_split); the outer axis is 'parallel'
    (sharded across TensorCores on v7x), the inner axis is the sequential
    reduction carrying the per-row VMEM accumulators.

    x_ref:       (TN, C) logits tile (native dtype), VMEM
    t_ref:       (TN, 1) int32 targets tile, VMEM
    out_ref:     (1, 2)  f32 per-split (sum, count) partial, SMEM
    acc_sum_ref: (TN, 1) f32 VMEM scratch, per-row focal-term partials
    acc_cnt_ref: (TN, 1) f32 VMEM scratch, per-row valid-count partials
    """
    c = pl.program_id(0)
    s = pl.program_id(1)
    gb = c * steps_per_split + s          # logical (unclamped) global block index

    @pl.when(s == 0)
    def _init():
        acc_sum_ref[...] = jnp.zeros_like(acc_sum_ref)
        acc_cnt_ref[...] = jnp.zeros_like(acc_cnt_ref)

    x = x_ref[...]                                      # (TN, C) native dtype
    t = t_ref[...]                                      # (TN, 1) int32

    # Numerically-stable log-softmax pieces in f32; full-width work is one
    # cast, one subtract, one exp and three row reduces.
    xf = x.astype(jnp.float32)
    m = jnp.max(xf, axis=1, keepdims=True)                             # (TN, 1)
    lse = jnp.log(jnp.sum(jnp.exp(xf - m), axis=1, keepdims=True))     # (TN, 1)

    # Gather the target logit with a one-hot row-reduce at native dtype
    # density (exact: a sum of zeros plus one element), widen afterwards.
    col = jax.lax.broadcasted_iota(jnp.int32, x.shape, 1)              # (TN, C)
    onehot = col == t
    picked = jnp.sum(jnp.where(onehot, x, jnp.zeros_like(x)),
                     axis=1, keepdims=True).astype(jnp.float32)        # (TN, 1)
    logpt = (picked - m) - lse                                         # (TN, 1)

    # Focal modulation on the picked column only.
    one_minus_pt = jnp.maximum(1.0 - jnp.exp(logpt), 0.0)              # (TN, 1)
    g = float(gamma)
    if g == 0.0:
        mod = jnp.ones_like(logpt)
    elif g.is_integer() and 0 < g <= 8:
        mod = one_minus_pt
        for _ in range(int(g) - 1):
            mod = mod * one_minus_pt
    else:
        mod = jnp.power(one_minus_pt, g)
    focal = mod * logpt                                                # (TN, 1)

    # Mask ignore_index rows, rows past N (partial last tile) and rows of the
    # clamped duplicate block (when nblocks does not split evenly).
    row = jax.lax.broadcasted_iota(jnp.int32, t.shape, 0) + gb * block_rows
    valid = (t != ignore_index) & (row < n_rows)                       # (TN, 1)

    acc_sum_ref[...] += jnp.where(valid, focal, 0.0)
    acc_cnt_ref[...] += jnp.where(valid, 1.0, 0.0)

    @pl.when(s == pl.num_programs(1) - 1)
    def _finalize():
        out_ref[0, 0] = jnp.sum(acc_sum_ref[...])
        out_ref[0, 1] = jnp.sum(acc_cnt_ref[...])


def _row_alignment(dtype):
    # Sub-32-bit dtypes pack 2/4 rows per sublane: 8 (f32), 16 (bf16), 32 (i8/fp8).
    return max(8, 32 // jnp.dtype(dtype).itemsize)


def _vmem_limit_bytes():
    cap = 64 * 1024 * 1024                      # conservative: v7x per-TC physical
    try:
        cap = int(pltpu.get_tpu_info().vmem_capacity_bytes)
    except Exception:
        pass
    # Explicit limit: at most half the physical VMEM, capped at 48 MiB
    # (=> 48 MiB on v5e/v6e, 32 MiB on v7x), never below 32 MiB.
    return int(min(max(cap // 2, 32 * 1024 * 1024), 48 * 1024 * 1024))


def _choose_block_rows(n, c, itemsize, align):
    # Resident-VMEM estimate per tile row:
    #   2 x double-buffered native logits row         : 2 * C * itemsize
    #   ~3 live full-width f32 temporaries            : 3 * C * 4
    #   ~8 live (TN,1) per-row temps + accumulators   : 8 * 512 (lane-padded)
    per_row = 2 * c * itemsize + 3 * c * 4 + 8 * 512
    budget = 16 * 1024 * 1024        # total resident target, << vmem_limit_bytes
    tn = budget // per_row
    tn = max(align, (tn // align) * align)
    return n if n <= tn else tn


def focal_loss(logits, target, gamma=2.0, ignore_index=-100, block_rows=None,
               num_splits=2):
    """Pallas implementation of FocalLoss(gamma, reduction='mean').forward.

    logits: [N, C] float (any float dtype; kept native, cast to f32 in-kernel)
    target: [N]    int
    returns: scalar float32 loss
    """
    N, C = logits.shape
    itemsize = jnp.dtype(logits.dtype).itemsize
    t2 = target.reshape(N, 1).astype(jnp.int32)

    align = _row_alignment(logits.dtype)
    if block_rows is None:
        block_rows = _choose_block_rows(N, C, itemsize, align)
    block_rows = int(block_rows)
    if block_rows >= N:
        block_rows = N                              # single full block (any N)
    else:
        block_rows = max(align, (block_rows // align) * align)

    nblocks = pl.cdiv(N, block_rows)
    # Outer 'parallel' axis: sharded across TensorCores on v7x (2 TC/chip);
    # on 1-TC chips it only reorders the same sequential steps (harmless).
    num_splits = max(1, min(int(num_splits), nblocks))
    steps = pl.cdiv(nblocks, num_splits)
    last_block = nblocks - 1

    def in_index(c, s):
        # Clamp so the padding step of an uneven split never DMAs out of
        # bounds; its rows are masked out inside the kernel via `row < N`.
        return (jnp.minimum(c * steps + s, last_block), 0)

    kernel = functools.partial(
        _focal_loss_kernel,
        gamma=float(gamma),
        ignore_index=int(ignore_index),
        n_rows=int(N),
        block_rows=block_rows,
        steps_per_split=steps,
    )

    cost = pl.CostEstimate(
        flops=int(5 * N * C),
        transcendentals=int(N * C),
        bytes_accessed=int(N * C * itemsize + N * 4 + num_splits * 8),
    )

    partials = pl.pallas_call(
        kernel,
        out_shape=jax.ShapeDtypeStruct((num_splits, 2), jnp.float32),
        grid=(num_splits, steps),
        in_specs=[
            pl.BlockSpec((block_rows, C), in_index),
            pl.BlockSpec((block_rows, 1), in_index),
        ],
        out_specs=pl.BlockSpec((1, 2), lambda c, s: (c, 0),
                               memory_space=pltpu.SMEM),
        scratch_shapes=[
            pltpu.VMEM((block_rows, 1), jnp.float32),
            pltpu.VMEM((block_rows, 1), jnp.float32),
        ],
        compiler_params=pltpu.CompilerParams(
            dimension_semantics=("parallel", "arbitrary"),
            vmem_limit_bytes=_vmem_limit_bytes(),
        ),
        cost_estimate=cost,
    )(logits, t2)

    # Final (-sum / count) combine across the per-split partials.
    # NOTE: if every target == ignore_index, count == 0 and this yields
    # NaN/inf, matching torch.nll_loss(reduction='mean') behaviour.
    return -(jnp.sum(partials[:, 0]) / jnp.sum(partials[:, 1]))


def _focal_loss_ref(logits, target, gamma=2.0, ignore_index=-100):
    """Pure-JAX reference (matches the PyTorch module)."""
    logpt = jax.nn.log_softmax(logits.astype(jnp.float32), axis=1)
    pt = jnp.exp(logpt)
    logpt = (1.0 - pt) ** gamma * logpt
    valid = target != ignore_index
    safe_t = jnp.where(valid, target, 0)
    picked = jnp.take_along_axis(logpt, safe_t[:, None], axis=1)[:, 0]
    picked = jnp.where(valid, picked, 0.0)
    return -jnp.sum(picked) / jnp.sum(valid.astype(jnp.float32))


if __name__ == "__main__":
    key = jax.random.PRNGKey(0)
    k1, k2, k3, k4 = jax.random.split(key, 4)

    # Case 1: small single-tile path (N=8, C=32) with one ignored row.
    N1, C1 = 8, 32
    logits1 = jax.random.normal(k1, (N1, C1), dtype=jnp.float32)
    target1 = jax.random.randint(k2, (N1,), 0, C1, dtype=jnp.int32)
    target1 = target1.at[3].set(-100)
    loss1 = jax.block_until_ready(focal_loss(logits1, target1, gamma=2.0))
    ref1 = jax.block_until_ready(_focal_loss_ref(logits1, target1, gamma=2.0))
    np.testing.assert_allclose(np.asarray(loss1), np.asarray(ref1),
                               rtol=1e-5, atol=1e-6)

    # Case 2: multi-tile path with a partial last tile and an uneven 2-way split
    # (N=40, TN=16 -> 3 blocks -> splits of 2+2 with one clamped/masked step).
    N2, C2 = 40, 128
    logits2 = jax.random.normal(k3, (N2, C2), dtype=jnp.float32)
    target2 = jax.random.randint(k4, (N2,), 0, C2, dtype=jnp.int32)
    target2 = target2.at[0].set(-100)
    target2 = target2.at[37].set(-100)
    loss2 = jax.block_until_ready(focal_loss(logits2, target2, block_rows=16))
    ref2 = jax.block_until_ready(_focal_loss_ref(logits2, target2))
    np.testing.assert_allclose(np.asarray(loss2), np.asarray(ref2),
                               rtol=1e-5, atol=1e-6)

    # Case 3: native bf16 logits (cast happens inside the kernel).
    logits3 = logits2.astype(jnp.bfloat16)
    loss3 = jax.block_until_ready(focal_loss(logits3, target2, block_rows=16))
    ref3 = jax.block_until_ready(_focal_loss_ref(logits3, target2))
    np.testing.assert_allclose(np.asarray(loss3), np.asarray(ref3),
                               rtol=1e-4, atol=1e-5)

    # Case 4: non-integer gamma exercises the clamped pow path.
    loss4 = jax.block_until_ready(focal_loss(logits1, target1, gamma=1.5))
    ref4 = jax.block_until_ready(_focal_loss_ref(logits1, target1, gamma=1.5))
    np.testing.assert_allclose(np.asarray(loss4), np.asarray(ref4),
                               rtol=1e-4, atol=1e-6)

    print("KERNEL_OK")
</pallas_src>

<mosaic_0001>
module attributes {stable_mosaic.version = 11 : i64} {
  func.func @_focal_loss_kernel(%arg0: i32, %arg1: i32, %arg2: memref<8x32xf32, #tpu.memory_space<vmem>>, %arg3: memref<8x1xi32, #tpu.memory_space<vmem>>, %arg4: memref<1x2xf32, #tpu.memory_space<smem>>, %arg5: memref<8x1xf32, #tpu.memory_space<vmem>>, %arg6: memref<8x1xf32, #tpu.memory_space<vmem>>) attributes {dimension_semantics = [#tpu.dimension_semantics<parallel>, #tpu.dimension_semantics<arbitrary>], iteration_bounds = array<i64: 1, 1>, scalar_prefetch = 0 : i64, scratch_operands = 2 : i64, tpu.core_type = #tpu.core_type<tc>, window_params = [{transform_indices = @transform_0, window_bounds = array<i64: 8, 32>}, {transform_indices = @transform_1, window_bounds = array<i64: 8, 1>}, {transform_indices = @transform_2, window_bounds = array<i64: 1, 2>}]} {
    %c1_i32 = arith.constant 1 : i32
    %0 = arith.muli %arg0, %c1_i32 : i32
    %1 = arith.addi %0, %arg1 : i32
    %c0_i32 = arith.constant 0 : i32
    %2 = arith.cmpi eq, %arg1, %c0_i32 : i32
    %3 = arith.extui %2 : i1 to i32
    %c0_i32_0 = arith.constant 0 : i32
    %4 = arith.cmpi ne, %3, %c0_i32_0 : i32
    scf.if %4 {
      %cst_23 = arith.constant 0.000000e+00 : f32
      %54 = vector.broadcast %cst_23 : f32 to vector<8x1xf32>
      %c0_24 = arith.constant 0 : index
      %c0_25 = arith.constant 0 : index
      %55 = vector.load %arg5[%c0_24, %c0_25] : memref<8x1xf32, #tpu.memory_space<vmem>>, vector<8x1xf32>
      tpu.vector_store %arg5[%c0_24, %c0_25], %54 {strides = array<i32>} : memref<8x1xf32, #tpu.memory_space<vmem>>, vector<8x1xf32>,
      %cst_26 = arith.constant 0.000000e+00 : f32
      %56 = vector.broadcast %cst_26 : f32 to vector<8x1xf32>
      %c0_27 = arith.constant 0 : index
      %c0_28 = arith.constant 0 : index
      %57 = vector.load %arg6[%c0_27, %c0_28] : memref<8x1xf32, #tpu.memory_space<vmem>>, vector<8x1xf32>
      tpu.vector_store %arg6[%c0_27, %c0_28], %56 {strides = array<i32>} : memref<8x1xf32, #tpu.memory_space<vmem>>, vector<8x1xf32>,
    } else {
    }
    %c0 = arith.constant 0 : index
    %c0_1 = arith.constant 0 : index
    %5 = vector.load %arg2[%c0, %c0_1] : memref<8x32xf32, #tpu.memory_space<vmem>>, vector<8x32xf32>
    %c0_2 = arith.constant 0 : index
    %c0_3 = arith.constant 0 : index
    %6 = vector.load %arg3[%c0_2, %c0_3] : memref<8x1xi32, #tpu.memory_space<vmem>>, vector<8x1xi32>
    %cst = arith.constant dense<0xFF800000> : vector<8xf32>
    %7 = vector.multi_reduction <maximumf>, %5, %cst [1] : vector<8x32xf32> to vector<8xf32>
    %8 = vector.shape_cast %7 : vector<8xf32> to vector<8x1xf32>
    %9 = vector.broadcast %8 : vector<8x1xf32> to vector<8x32xf32>
    %10 = arith.subf %5, %9 : vector<8x32xf32>
    %11 = math.exp %10 : vector<8x32xf32>
    %cst_4 = arith.constant dense<0.000000e+00> : vector<8xf32>
    %12 = vector.multi_reduction <add>, %11, %cst_4 [1] : vector<8x32xf32> to vector<8xf32>
    %13 = vector.shape_cast %12 : vector<8xf32> to vector<8x1xf32>
    %14 = math.log %13 : vector<8x1xf32>
    %15 = tpu.iota {dimensions = array<i32: 1>} : vector<8x32xi32>
    %16 = vector.broadcast %6 : vector<8x1xi32> to vector<8x32xi32>
    %17 = arith.cmpi eq, %15, %16 : vector<8x32xi32>
    %cst_5 = arith.constant 0.000000e+00 : f32
    %18 = vector.broadcast %cst_5 : f32 to vector<8x32xf32>
    %19 = arith.select %17, %5, %18 : vector<8x32xi1>, vector<8x32xf32>
    %cst_6 = arith.constant dense<0.000000e+00> : vector<8xf32>
    %20 = vector.multi_reduction <add>, %19, %cst_6 [1] : vector<8x32xf32> to vector<8xf32>
    %21 = vector.shape_cast %20 : vector<8xf32> to vector<8x1xf32>
    %22 = arith.subf %21, %8 : vector<8x1xf32>
    %23 = arith.subf %22, %14 : vector<8x1xf32>
    %24 = math.exp %23 : vector<8x1xf32>
    %cst_7 = arith.constant 1.000000e+00 : f32
    %25 = vector.broadcast %cst_7 : f32 to vector<8x1xf32>
    %26 = arith.subf %25, %24 : vector<8x1xf32>
    %cst_8 = arith.constant 0.000000e+00 : f32
    %27 = vector.broadcast %cst_8 : f32 to vector<8x1xf32>
    %28 = arith.maximumf %26, %27 : vector<8x1xf32>
    %29 = arith.mulf %28, %28 : vector<8x1xf32>
    %30 = arith.mulf %29, %23 : vector<8x1xf32>
    %31 = tpu.iota {dimensions = array<i32: 0>} : vector<8x1xi32>
    %c8_i32 = arith.constant 8 : i32
    %32 = arith.muli %1, %c8_i32 : i32
    %33 = vector.broadcast %32 : i32 to vector<8x1xi32>
    %34 = arith.addi %31, %33 : vector<8x1xi32>
    %c-100_i32 = arith.constant -100 : i32
    %35 = vector.broadcast %c-100_i32 : i32 to vector<8x1xi32>
    %36 = arith.cmpi ne, %6, %35 : vector<8x1xi32>
    %c8_i32_9 = arith.constant 8 : i32
    %37 = vector.broadcast %c8_i32_9 : i32 to vector<8x1xi32>
    %38 = arith.cmpi slt, %34, %37 : vector<8x1xi32>
    %39 = arith.andi %36, %38 : vector<8x1xi1>
    %c0_10 = arith.constant 0 : index
    %c0_11 = arith.constant 0 : index
    %40 = vector.load %arg5[%c0_10, %c0_11] : memref<8x1xf32, #tpu.memory_space<vmem>>, vector<8x1xf32>
    %cst_12 = arith.constant 0.000000e+00 : f32
    %41 = vector.broadcast %cst_12 : f32 to vector<8x1xf32>
    %42 = arith.select %39, %30, %41 : vector<8x1xi1>, vector<8x1xf32>
    %43 = arith.addf %40, %42 : vector<8x1xf32>
    %c0_13 = arith.constant 0 : index
    %c0_14 = arith.constant 0 : index
    %44 = vector.load %arg5[%c0_13, %c0_14] : memref<8x1xf32, #tpu.memory_space<vmem>>, vector<8x1xf32>
    tpu.vector_store %arg5[%c0_13, %c0_14], %43 {strides = array<i32>} : memref<8x1xf32, #tpu.memory_space<vmem>>, vector<8x1xf32>,
    %c0_15 = arith.constant 0 : index
    %c0_16 = arith.constant 0 : index
    %45 = vector.load %arg6[%c0_15, %c0_16] : memref<8x1xf32, #tpu.memory_space<vmem>>, vector<8x1xf32>
    %cst_17 = arith.constant 1.000000e+00 : f32
    %cst_18 = arith.constant 0.000000e+00 : f32
    %46 = vector.broadcast %cst_17 : f32 to vector<8x1xf32>
    %47 = vector.broadcast %cst_18 : f32 to vector<8x1xf32>
    %48 = arith.select %39, %46, %47 : vector<8x1xi1>, vector<8x1xf32>
    %49 = arith.addf %45, %48 : vector<8x1xf32>
    %c0_19 = arith.constant 0 : index
    %c0_20 = arith.constant 0 : index
    %50 = vector.load %arg6[%c0_19, %c0_20] : memref<8x1xf32, #tpu.memory_space<vmem>>, vector<8x1xf32>
    tpu.vector_store %arg6[%c0_19, %c0_20], %49 {strides = array<i32>} : memref<8x1xf32, #tpu.memory_space<vmem>>, vector<8x1xf32>,
    %c0_i32_21 = arith.constant 0 : i32
    %51 = arith.cmpi eq, %arg1, %c0_i32_21 : i32
    %52 = arith.extui %51 : i1 to i32
    %c0_i32_22 = arith.constant 0 : i32
    %53 = arith.cmpi ne, %52, %c0_i32_22 : i32
    scf.if %53 {
      %c0_23 = arith.constant 0 : index
      %c0_24 = arith.constant 0 : index
      %54 = vector.load %arg5[%c0_23, %c0_24] : memref<8x1xf32, #tpu.memory_space<vmem>>, vector<8x1xf32>
      %55 = vector.shape_cast %54 : vector<8x1xf32> to vector<1x8x1xf32>
      %cst_25 = arith.constant dense<0.000000e+00> : vector<1xf32>
      %56 = vector.multi_reduction <add>, %55, %cst_25 [1, 2] : vector<1x8x1xf32> to vector<1xf32>
      %57 = vector.shape_cast %56 : vector<1xf32> to vector<1x1x1xf32>
      %58 = vector.extract %57[0, 0, 0] : f32 from vector<1x1x1xf32>
      %c0_26 = arith.constant 0 : index
      %c0_27 = arith.constant 0 : index
      %59 = memref.load %arg4[%c0_26, %c0_27] : memref<1x2xf32, #tpu.memory_space<smem>>
      memref.store %58, %arg4[%c0_26, %c0_27] : memref<1x2xf32, #tpu.memory_space<smem>>
      %c0_28 = arith.constant 0 : index
      %c0_29 = arith.constant 0 : index
      %60 = vector.load %arg6[%c0_28, %c0_29] : memref<8x1xf32, #tpu.memory_space<vmem>>, vector<8x1xf32>
      %61 = vector.shape_cast %60 : vector<8x1xf32> to vector<1x8x1xf32>
      %cst_30 = arith.constant dense<0.000000e+00> : vector<1xf32>
      %62 = vector.multi_reduction <add>, %61, %cst_30 [1, 2] : vector<1x8x1xf32> to vector<1xf32>
      %63 = vector.shape_cast %62 : vector<1xf32> to vector<1x1x1xf32>
      %64 = vector.extract %63[0, 0, 0] : f32 from vector<1x1x1xf32>
      %c0_31 = arith.constant 0 : index
      %c1 = arith.constant 1 : index
      %65 = memref.load %arg4[%c0_31, %c1] : memref<1x2xf32, #tpu.memory_space<smem>>
      memref.store %64, %arg4[%c0_31, %c1] : memref<1x2xf32, #tpu.memory_space<smem>>
    } else {
    }
    return
  }
  func.func @transform_0(%arg0: i32, %arg1: i32) -> (i32, i32) {
    %c1_i32 = arith.constant 1 : i32
    %0 = arith.muli %arg0, %c1_i32 : i32
    %1 = arith.addi %0, %arg1 : i32
    %c0_i32 = arith.constant 0 : i32
    %2 = arith.minsi %1, %c0_i32 : i32
    %c0_i32_0 = arith.constant 0 : i32
    %c0_i32_1 = arith.constant 0 : i32
    return %2, %c0_i32_0 : i32, i32
  }
  func.func @transform_1(%arg0: i32, %arg1: i32) -> (i32, i32) {
    %c1_i32 = arith.constant 1 : i32
    %0 = arith.muli %arg0, %c1_i32 : i32
    %1 = arith.addi %0, %arg1 : i32
    %c0_i32 = arith.constant 0 : i32
    %2 = arith.minsi %1, %c0_i32 : i32
    %c0_i32_0 = arith.constant 0 : i32
    %c0_i32_1 = arith.constant 0 : i32
    return %2, %c0_i32_0 : i32, i32
  }
  func.func @transform_2(%arg0: i32, %arg1: i32) -> (i32, i32) {
    %c0_i32 = arith.constant 0 : i32
    %c0_i32_0 = arith.constant 0 : i32
    return %arg0, %c0_i32 : i32, i32
  }
}

</mosaic_0001>

<bundles_post_ra>
// kernel: tpu_custom_call.1
= control target key start
LH: loop header
LB: loop body
LE: loop exit
PB: predicated region body
PF: predicated region fallthrough
CT: control target
= control target key end

     0   :  { %vm76_vm0 = vcmask 261120   ;;  %vm71_vm1 = vcmask 7168   ;;  %v207_v2 = vmov 0   ;;  %v208_v3 = vmov 0.0   ;;  %s245_s0 = inlined_call_operand.vmem [shape: f32[8,32], index: 0, kind: input, shape index: {}]   ;;  %s246_s1 = inlined_call_operand.vmem [shape: s32[8,1], index: 1, kind: input, shape index: {}]   ;;  %s247_s2 = inlined_call_operand.hbm [shape: f32[1,2], index: 2, kind: output, shape index: {}]  }
   0x1   :  { %v74_v0 = vld [vmem:[%s245_s0] sm:$0xff]  ;;  %186 = vset.pattern.permute.xlu0 %v207_v2  ;;  %72 = vst.msk [vmem:[#allocation2] sm:$0xff] %vm71_vm1, %v208_v3 }
   0x2   :  { %v77_v1 = vsel %vm76_vm0, %v74_v0, -inf }
   0x3   :  { %7 = vsyncpa [#allocation5], 0  ;;  %78 = vmax.xlane.f32.xlu0 %v77_v1  ;;  %73 = vst.msk [vmem:[#allocation3] sm:$0xff] %vm71_vm1, %v208_v3  ;;  %v75_v4 = vld [vmem:[%s246_s1] sm:$0xff]  ;;  %v88_v13 = vlaneseq  ;;  %s157_s14 = sshll.u32 %s247_s2, 4  ;;  %s209_s16 = smov [#allocation4]   ;;  %s158_s14 = int_to_ptr.hbm [resolvable:$true] %s157_s14 }
   0x4   :  { %vm111_vm2 = vcmp.ne.s32.totalorder %v75_v4, 4294967196 }
   0x5   :  { %v120_v5 = vsel %vm111_vm2, 1.0, %v208_v3  ;;  %v89_v14 = vand.u32 127, %v88_v13 }
   0x8   :  { %v114_v30 = vld [vmem:[#allocation2] sm:$0xff] }
   0xa   :  { %v119_v6 = vld [vmem:[#allocation3] sm:$0xff] }
   0xb   :  { %v121_v7 = vadd.f32 %v120_v5, %v119_v6 }
   0xd   :  { %122 = vst.msk [vmem:[#allocation3] sm:$0xff] %vm71_vm1, %v121_v7 }
  0x14   :  { %v139_v35 = vld [vmem:[#allocation3] sm:$0xff] }
  0x15   :  { %v140_v36 = vsel %vm71_vm1, %v139_v35, 0.0 }
  0x17   :  { %91 = vperm.xlu0 %186, %v75_v4  }
  0x76   :  { %v79_v8 = vpop.xlane.xlu0 %78 }
  0x77   :  { %v80_v9 = vsub.f32 %v74_v0, %v79_v8 }
  0x79   :  { %v81_v10 = vmul.f32 1.442695, %v80_v9 }
  0x7b   :  { %187 = vpow2.f32 %v81_v10 }
  0x81   :  { %v188_v11 = vpop.eup %187 }
  0x82   :  { %v83_v12 = vsel %vm76_vm0, %v188_v11, 0.0 }
  0x83   :  { %84 = vadd.xlane.f32.xlu1 %v83_v12 }
  0x89   :  { %v92_v15 = vpop.permute.xlu0 %91 }
  0x8a   :  { %vm93_vm3 = vcmp.eq.s32.totalorder %v89_v14, %v92_v15 }
  0x8b   :  { %v94_v16 = vsel %vm93_vm3, %v74_v0, 0.0 }
  0x8c   :  { %v95_v17 = vsel %vm76_vm0, %v94_v16, 0.0 }
  0x8d   :  { %96 = vadd.xlane.f32.xlu1 %v95_v17 }
  0xf6   :  { %v85_v18 = vpop.xlane.xlu1 %84 }
  0xf7   :  { %189 = vlog2.f32 %v85_v18 }
  0xfd   :  { %v190_v19 = vpop.eup %189 }
  0xfe   :  { %v87_v21 = vmul.f32 0.6931472, %v190_v19 }
 0x100   :  { %v97_v20 = vpop.xlane.xlu1 %96 }
 0x101   :  { %v98_v22 = vsub.f32 %v97_v20, %v79_v8 }
 0x103   :  { %v99_v23 = vsub.f32 %v98_v22, %v87_v21 }
 0x105   :  { %v100_v24 = vmul.f32 1.442695, %v99_v23 }
 0x107   :  { %191 = vpow2.f32 %v100_v24 }
 0x10d   :  { %v192_v25 = vpop.eup %191 }
 0x10e   :  { %v102_v26 = vsub.f32 1.0, %v192_v25 }
 0x110   :  { %v103_v27 = vmax.f32 %v102_v26, 0.0 }
 0x112   :  { %v104_v28 = vmul.f32 %v103_v27, %v103_v27 }
 0x114   :  { %v105_v29 = vmul.f32 %v104_v28, %v99_v23 }
 0x116   :  { %v115_v31 = vsel %vm111_vm2, %v105_v29, 0.0 }
 0x117   :  { %v116_v32 = vadd.f32 %v115_v31, %v114_v30 }
 0x119   :  { %118 = vst.msk [vmem:[#allocation2] sm:$0xff] %vm71_vm1, %v116_v32 }
 0x120   :  { %v126_v33 = vld [vmem:[#allocation2] sm:$0xff] }
 0x121   :  { %v127_v34 = vsel %vm71_vm1, %v126_v33, 0.0 }
 0x122   :  { %128 = vadd.xlane.f32.xlu2 %v127_v34 }
 0x12a   :  { %141 = vadd.xlane.f32.xlu2 %v140_v36 }
 0x195   :  { %v129_v37 = vpop.xlane.xlu2 %128 }
 0x196   :  { %v130_v38 = vrot.slane %v129_v37, 4 }
 0x198   :  { %v131_v39 = vadd.f32 %v130_v38, %v129_v37 }
 0x19a   :  { %v132_v40 = vrot.slane %v131_v39, 2 }
 0x19c   :  { %v133_v41 = vadd.f32 %v132_v40, %v131_v39 }
 0x19d   :  { %v142_v42 = vpop.xlane.xlu2 %141 }
 0x19e   :  { %v143_v43 = vrot.slane %v142_v42, 4  ;;  %v134_v44 = vrot.slane %v133_v41, 1 }
 0x1a0   :  { %v144_v45 = vadd.f32 %v143_v43, %v142_v42  ;;  %v135_v46 = vadd.f32 %v134_v44, %v133_v41 }
 0x1a2   :  { %v145_v47 = vrot.slane %v144_v45, 2  ;;  %179 = vpush %v135_v46 }
 0x1a4   :  { %v146_v48 = vadd.f32 %v145_v47, %v144_v45 }
 0x1a6   :  { %v147_v49 = vrot.slane %v146_v48, 1 }
 0x1a8   :  { %v148_v50 = vadd.f32 %v147_v49, %v146_v48 }
 0x1aa   :  { %181 = vpush %v148_v50 }
 0x1d3   :  { %s180_s0 = spop %179 }
 0x1d4   :  { %138 = sst [smem:[#allocation4]] %s180_s0 }
 0x1db   :  { %s182_s15 = spop %181 }
 0x1dc   :  { %151 = sst [smem:[#allocation4 + $0x1]] %s182_s15 }
 0x1dd   :  { %160 = dma.smem_to_hbm %s209_s16, 16, %s158_s14, [#allocation5]  }
 0x1de   :  { %205 = dma.done.wait [#allocation5], 16  }
 0x1df   :  { %206 = vsyncadd [#allocation5], 4294967280 }
 0x1e0   :  { %165 = sfence }
 0x1e1   :  { %166 = vsyncpa [#allocation5], 1 }

</bundles_post_ra>
